<compile_context>
chip_gen: v6e
topology: v6e:2x2x1
jax: 0.10.0
libtpu: 0.0.40
codegen_flags: <defaults>
</compile_context>

<pallas_src>
import functools

import jax
import jax.numpy as jnp
from jax.experimental import pallas as pl
from jax.experimental.pallas import tpu as pltpu


def _pe_kernel(x_ref, w_ref, b_ref, o_ref):
    # x_ref: (TR, P*F)       packed input rows
    # w_ref: (P*F, 2*P*D)    [block-diag dup'd exp weights (/80) | angle weights]
    # b_ref: (1, 2*P*D)      matching biases (/80 on exp, +pi/2 on cos lanes)
    # o_ref: (TR, P*D)       packed output rows (lane-dense, P*D == 128)
    x = x_ref[...].astype(jnp.float32)

    # Single fused MXU matmul for both projections of all packed rows.
    lin = jnp.dot(x, w_ref[...], preferred_element_type=jnp.float32) + b_ref[...]

    pd = o_ref.shape[1]                 # P*D
    e = jnp.exp(lin[:, :pd])            # /80 already folded into w/b  (EUP)
    trig = jnp.sin(lin[:, pd:])         # cos-half handled by +pi/2 bias phase (EUP)

    o_ref[...] = (e * trig).astype(o_ref.dtype)


def prepare_params(w_exp, b_exp, w_ang, b_ang):
    """Build the fused, lane-packed parameters ONCE (hoisted out of forward).

    Weights: w_* (F, H), b_* (H,).  Returns (w_full, b_full) with
    w_full: (P*F, 2*P*D), b_full: (1, 2*P*D), where D = 2*H and P = 128 // D
    logical rows are packed per 128-lane row.
    """
    F, H = w_exp.shape
    D = 2 * H
    P = (128 // D) if (D <= 128 and 128 % D == 0) else 1

    # Fold 1/80 into the exp projection; fold cos(x) = sin(x + pi/2) into the
    # angle bias so the kernel only needs exp + sin.
    w_e = (w_exp / 80.0).astype(jnp.float32)
    b_e = (b_exp / 80.0).astype(jnp.float32)
    w_a = w_ang.astype(jnp.float32)
    b_a_sin = b_ang.astype(jnp.float32)
    b_a_cos = b_a_sin + jnp.float32(jnp.pi / 2)

    # Duplicate exp / angle columns so both the sin-half and cos-half lanes of
    # each D-wide group see the value they need.
    w_e_dup = jnp.concatenate([w_e, w_e], axis=1)            # (F, D)
    w_a_dup = jnp.concatenate([w_a, w_a], axis=1)            # (F, D)
    eye_p = jnp.eye(P, dtype=jnp.float32)
    w_e_bd = jnp.kron(eye_p, w_e_dup)                        # (P*F, P*D)
    w_a_bd = jnp.kron(eye_p, w_a_dup)                        # (P*F, P*D)
    w_full = jnp.concatenate([w_e_bd, w_a_bd], axis=1)       # (P*F, 2*P*D)

    b_e_full = jnp.tile(jnp.concatenate([b_e, b_e]), P)             # (P*D,)
    b_a_full = jnp.tile(jnp.concatenate([b_a_sin, b_a_cos]), P)     # (P*D,)
    b_full = jnp.concatenate([b_e_full, b_a_full]).reshape(1, 2 * P * D)

    return w_full, b_full


@functools.partial(jax.jit, static_argnames=("tile_rows",))
def trainable_positional_encoding(x, w_full, b_full, *, tile_rows=1024):
    """x: (B, S, F).  w_full/b_full from prepare_params.  Returns (B, S, D)."""
    B, S, F = x.shape
    PF, PD2 = w_full.shape                  # (P*F, 2*P*D)
    P = PF // F
    PD = PD2 // 2                           # P*D
    D = PD // P
    M = B * S

    # Pack P logical rows (width D) into one 128-lane row.  Pad only up to the
    # next multiple of P (<= P-1 rows), so when M % P == 0 the final slice is
    # a no-op view (no extra full-output HBM copy).
    M_pack = pl.cdiv(M, P) * P
    x2 = x.reshape(M, F)
    if M_pack != M:
        x2 = jnp.pad(x2, ((0, M_pack - M), (0, 0)))
    rows = M_pack // P
    x_packed = x2.reshape(rows, P * F)

    # Tile over packed rows: large tiles (amortize ~0.35us/step) but aim for
    # >= 2 grid steps so v7x can shard the parallel axis across both TCs.
    if rows <= 8:
        tr = rows                                       # single full-extent block
    else:
        half = (((rows + 1) // 2) + 7) // 8 * 8         # ~rows/2, sublane-aligned
        tr = max(8, min(tile_rows, half))
    grid = (pl.cdiv(rows, tr),)                         # ragged last block is masked

    out_packed = pl.pallas_call(
        _pe_kernel,
        out_shape=jax.ShapeDtypeStruct((rows, PD), x.dtype),
        grid=grid,
        in_specs=[
            pl.BlockSpec((tr, PF), lambda i: (i, 0)),        # packed input rows
            pl.BlockSpec((PF, PD2), lambda i: (0, 0)),       # fused weights
            pl.BlockSpec((1, PD2), lambda i: (0, 0)),        # fused biases
        ],
        out_specs=pl.BlockSpec((tr, PD), lambda i: (i, 0)),
        compiler_params=pltpu.CompilerParams(
            dimension_semantics=("parallel",)),
        cost_estimate=pl.CostEstimate(
            flops=2 * M * F * (2 * D),
            transcendentals=2 * M * D,
            bytes_accessed=4 * M * (F + D),
        ),
    )(x_packed, w_full, b_full)

    # (rows, P*D) row-major is the same memory as (M_pack, D) row-major.
    out = out_packed.reshape(M_pack, D)
    if M_pack != M:
        out = out[:M]
    return out.reshape(B, S, D)


def reference(x, w_exp, b_exp, w_ang, b_ang):
    e_lin = x @ w_exp + b_exp
    a_lin = x @ w_ang + b_ang
    e = jnp.exp(e_lin / 80.0)
    return jnp.concatenate([e * jnp.sin(a_lin), e * jnp.cos(a_lin)], axis=-1)


if __name__ == "__main__":
    # Small shapes consistent with the module: batch=2, seq=8, num_of_features=4,
    # encoding_dim=32 (must be even) -> H = 16.
    B, S, F = 2, 8, 4
    encoding_dim = 32
    H = encoding_dim // 2

    key = jax.random.PRNGKey(0)
    kx, kwe, kbe, kwa, kba = jax.random.split(key, 5)

    # Deterministic parameter init (PyTorch Linear default: U(-1/sqrt(fan_in), +)).
    bound = 1.0 / jnp.sqrt(jnp.float32(F))
    w_exp = jax.random.uniform(kwe, (F, H), jnp.float32, -bound, bound)
    b_exp = jax.random.uniform(kbe, (H,), jnp.float32, -bound, bound)
    w_ang = jax.random.uniform(kwa, (F, H), jnp.float32, -bound, bound)
    b_ang = jax.random.uniform(kba, (H,), jnp.float32, -bound, bound)

    x = jax.random.normal(kx, (B, S, F), jnp.float32)

    # Fused parameters built once (would be cached alongside module params).
    w_full, b_full = prepare_params(w_exp, b_exp, w_ang, b_ang)

    out = trainable_positional_encoding(x, w_full, b_full)
    out = jax.block_until_ready(out)

    ref = reference(x, w_exp, b_exp, w_ang, b_ang)
    assert out.shape == (B, S, encoding_dim)
    assert jnp.allclose(out, ref, atol=1e-5, rtol=1e-5)

    print("KERNEL_OK")
</pallas_src>

<mosaic_0001>
module attributes {stable_mosaic.version = 11 : i64} {
  func.func @_pe_kernel(%arg0: i32, %arg1: memref<4x16xf32, #tpu.memory_space<vmem>>, %arg2: memref<16x256xf32, #tpu.memory_space<vmem>>, %arg3: memref<1x256xf32, #tpu.memory_space<vmem>>, %arg4: memref<4x128xf32, #tpu.memory_space<vmem>>) attributes {dimension_semantics = [#tpu.dimension_semantics<parallel>], iteration_bounds = array<i64: 1>, scalar_prefetch = 0 : i64, scratch_operands = 0 : i64, tpu.core_type = #tpu.core_type<tc>, window_params = [{transform_indices = @transform_0, window_bounds = array<i64: 4, 16>}, {pipeline_mode = #tpu.pipeline_mode<synchronous>, transform_indices = @transform_1, window_bounds = array<i64: 16, 256>}, {pipeline_mode = #tpu.pipeline_mode<synchronous>, transform_indices = @transform_2, window_bounds = array<i64: 1, 256>}, {transform_indices = @transform_3, window_bounds = array<i64: 4, 128>}]} {
    %c0 = arith.constant 0 : index
    %c0_0 = arith.constant 0 : index
    %0 = vector.load %arg1[%c0, %c0_0] : memref<4x16xf32, #tpu.memory_space<vmem>>, vector<4x16xf32>
    %c0_1 = arith.constant 0 : index
    %c0_2 = arith.constant 0 : index
    %1 = vector.load %arg2[%c0_1, %c0_2] : memref<16x256xf32, #tpu.memory_space<vmem>>, vector<16x256xf32>
    %cst = arith.constant dense<0.000000e+00> : vector<4x256xf32>
    %2 = tpu.matmul %0, %1, %cst {dimension_numbers = #tpu.dot_dimension_numbers<[1], [0], [0], [1], [0, 0, 1, 1], [], []>} : vector<4x16xf32>, vector<16x256xf32>, vector<4x256xf32> -> vector<4x256xf32>
    %c0_3 = arith.constant 0 : index
    %c0_4 = arith.constant 0 : index
    %3 = vector.load %arg3[%c0_3, %c0_4] : memref<1x256xf32, #tpu.memory_space<vmem>>, vector<1x256xf32>
    %4 = vector.broadcast %3 : vector<1x256xf32> to vector<4x256xf32>
    %5 = arith.addf %2, %4 : vector<4x256xf32>
    %6 = vector.extract_strided_slice %5 {offsets = [0, 0], sizes = [4, 128], strides = [1, 1]} : vector<4x256xf32> to vector<4x128xf32>
    %7 = math.exp %6 : vector<4x128xf32>
    %8 = vector.extract_strided_slice %5 {offsets = [0, 128], sizes = [4, 128], strides = [1, 1]} : vector<4x256xf32> to vector<4x128xf32>
    %9 = math.sin %8 : vector<4x128xf32>
    %10 = arith.mulf %7, %9 : vector<4x128xf32>
    %c0_5 = arith.constant 0 : index
    %c0_6 = arith.constant 0 : index
    %11 = vector.load %arg4[%c0_5, %c0_6] : memref<4x128xf32, #tpu.memory_space<vmem>>, vector<4x128xf32>
    tpu.vector_store %arg4[%c0_5, %c0_6], %10 {strides = array<i32>} : memref<4x128xf32, #tpu.memory_space<vmem>>, vector<4x128xf32>,
    return
  }
  func.func @transform_0(%arg0: i32) -> (i32, i32) {
    %c0_i32 = arith.constant 0 : i32
    %c0_i32_0 = arith.constant 0 : i32
    return %arg0, %c0_i32 : i32, i32
  }
  func.func @transform_1(%arg0: i32) -> (i32, i32) {
    %c0_i32 = arith.constant 0 : i32
    %c0_i32_0 = arith.constant 0 : i32
    %c0_i32_1 = arith.constant 0 : i32
    return %c0_i32, %c0_i32_0 : i32, i32
  }
  func.func @transform_2(%arg0: i32) -> (i32, i32) {
    %c0_i32 = arith.constant 0 : i32
    %c0_i32_0 = arith.constant 0 : i32
    %c0_i32_1 = arith.constant 0 : i32
    return %c0_i32, %c0_i32_0 : i32, i32
  }
  func.func @transform_3(%arg0: i32) -> (i32, i32) {
    %c0_i32 = arith.constant 0 : i32
    %c0_i32_0 = arith.constant 0 : i32
    return %arg0, %c0_i32 : i32, i32
  }
}

</mosaic_0001>

<bundles_post_ra>
// kernel: trainable_positional_encoding.1
= control target key start
LH: loop header
LB: loop body
LE: loop exit
PB: predicated region body
PF: predicated region fallthrough
CT: control target
= control target key end

     0   :  { %v240_v3 = vmov 0.0   ;;  %vm31_vm0 = vcmask 130048   ;;  %v21_v6 = vlaneseq  ;;  %v241_v24 = vmov 683565275   ;;  %s320_s1 = inlined_call_operand.vmem [shape: f32[16,256], index: 1, kind: input, shape index: {}]   ;;  %s321_s0 = inlined_call_operand.vmem [shape: f32[4,16], index: 0, kind: input, shape index: {}]   ;;  %s322_s2 = inlined_call_operand.vmem [shape: f32[1,256], index: 2, kind: input, shape index: {}]   ;;  %s323_s3 = inlined_call_operand.vmem [shape: f32[4,128], index: 3, kind: output, shape index: {}]  }
   0x1   :  { %v18_v0 = vld [vmem:[%s320_s1 + $0x18] sm:$0xff]  ;;  %v17_v1 = vld [vmem:[%s320_s1 + $0x10] sm:$0xff]  ;;  %v16_v2 = vld [vmem:[%s320_s1 + $0x8] sm:$0xff]  ;;  %99 = vmatprep.mubr.f32.mxu0 %v240_v3  ;;  %v242_v26 = vmov 2475754826  }
   0x2   :  { %63 = vmatprep.subr.mxu0 %v18_v0  ;;  %v15_v4 = vld [vmem:[%s320_s1] sm:$0xff]  ;;  %v282_v7 = vshrl.u32 %v21_v6, 7  ;;  %v243_v29 = vmov 2131351028   ;;  %v244_v32 = vmov 2102212464  }
   0x3   :  { %64 = vmatpush1.msra.mxu0 %v17_v1  ;;  %v14_v5 = vld [vmem:[%s321_s0] sm:$0xf]  ;;  %v245_v35 = vmov 920167782   ;;  %v246_v38 = vmov 1326507024  }
   0x4   :  { %65 = vmatprep.subr.mxu0 %v16_v2  ;;  %v27_v8 = vsub.s32 1, %v282_v7  ;;  %v288_v9 = vld [vmem:[%s322_s2] sm:$0x3] }
   0x5   :  { %66 = vmatpush1.msra.mxu0 %v15_v4 }
   0x6   :  { %218 = vmatmul.mubr.msk.f32.vlgmr.msra.gmra.mxu0 %vm31_vm0, %v14_v5  ;;  %v28_v10 = vrot.slane %v288_v9, %v27_v8 }
  0xc6   :  { %v291_v11 = vpop.f32.mrf.mxu0 }
  0xc8   :  { %v103_v12 = vpop.f32.mrf.mxu0 }
  0xc9   :  { %v293_v13 = vadd.f32 %v103_v12, %v28_v10 }
  0xcb   :  { %v111_v14 = vand.u32 2139095040, %v293_v13  ;;  %v108_v18 = vand.u32 2147483647, %v293_v13  ;;  %vm110_vm8 = vcmp.lt.s32.totalorder %v293_v13, 0  ;;  %vm200_vm13 = vweird.f32 %v293_v13 }
  0xcd   :  { %v112_v15 = vshrl.u32 %v111_v14, 23  ;;  %v115_v21 = vand.u32 8388607, %v108_v18  ;;  %vm109_vm9 = vcmp.le.f32.partialorder %v108_v18, 0.7853982 }
  0xcf   :  { %v219_v16 = vadd.s32 4294967169, %v112_v15  ;;  %v116_v40 = vor.u32 8388608, %v115_v21 }
  0xd1   :  { %v118_v17 = vadd.s32 1, %v219_v16  ;;  %v156_v54 = vshll.u32 %v116_v40, 8 }
  0xd3   :  { %vm119_vm1 = vcmp.gt.s32.totalorder %v118_v17, 0 }
  0xd4   :  { %v120_v19 = vsel %vm119_vm1, %v118_v17, 0 }
  0xd5   :  { %v122_v20 = vand.u32 31, %v120_v19  ;;  %v121_v23 = vshrl.u32 %v120_v19, 5 }
  0xd7   :  { %v123_v22 = vsub.s32 32, %v122_v20  ;;  %v125_v25 = vshll.u32 %v241_v24, %v122_v20  ;;  %v128_v27 = vshll.u32 %v242_v26, %v122_v20  ;;  %v131_v31 = vshll.u32 %v243_v29, %v122_v20 }
  0xd8   :  { %v134_v34 = vshll.u32 %v244_v32, %v122_v20  ;;  %v137_v37 = vshll.u32 %v245_v35, %v122_v20  ;;  %vm140_vm2 = vcmp.lt.s32.totalorder %v121_v23, 1  ;;  %vm143_vm3 = vcmp.lt.s32.totalorder %v121_v23, 4 }
  0xd9   :  { %v126_v28 = vshrl.u32 %v242_v26, %v123_v22  ;;  %v129_v30 = vshrl.u32 %v243_v29, %v123_v22  ;;  %v132_v33 = vshrl.u32 %v244_v32, %v123_v22  ;;  %v135_v36 = vshrl.u32 %v245_v35, %v123_v22 }
  0xda   :  { %v138_v39 = vshrl.u32 %v246_v38, %v123_v22  ;;  %v124_v49 = vshrl.u32 %v241_v24, %v123_v22  ;;  %vm142_vm4 = vcmp.lt.s32.totalorder %v121_v23, 3  ;;  %vm141_vm5 = vcmp.lt.s32.totalorder %v121_v23, 2 }
  0xdb   :  { %v127_v41 = vor.u32 %v126_v28, %v125_v25  ;;  %v130_v42 = vor.u32 %v129_v30, %v128_v27  ;;  %v133_v43 = vor.u32 %v132_v33, %v131_v31  ;;  %v136_v44 = vor.u32 %v135_v36, %v134_v34 }
  0xdc   :  { %v139_v45 = vor.u32 %v138_v39, %v137_v37  ;;  %v23_v26 = vsub.s32 0, %v282_v7 }
  0xdd   :  { %v145_v46 = vsel %vm143_vm3, %v133_v43, 2102212464  ;;  %v148_v47 = vsel %vm140_vm2, %v127_v41, %v130_v42  ;;  %v152_v48 = vsel %vm140_vm2, %v130_v42, %v133_v43  ;;  %v149_v50 = vsel %vm143_vm3, %v136_v44, 920167782 }
  0xde   :  { %v153_v51 = vsel %vm143_vm3, %v139_v45, 1326507024  ;;  %v150_v52 = vsel %vm142_vm4, %v133_v43, %v149_v50  ;;  %v144_v55 = vsel %vm140_vm2, %v124_v49, %v127_v41  ;;  %v146_v56 = vsel %vm142_vm4, %v130_v42, %v145_v46 }
  0xdf   :  { %v154_v53 = vsel %vm142_vm4, %v136_v44, %v153_v51  ;;  %v151_v57 = vsel %vm141_vm5, %v148_v47, %v150_v52  ;;  %v147_v63 = vsel %vm141_vm5, %v144_v55, %v146_v56  ;;  %v24_v30 = vrot.slane %v288_v9, %v23_v26 }
  0xe0   :  { %v155_v58 = vsel %vm141_vm5, %v152_v48, %v154_v53  ;;  %v302_v61 = vmul.u32.u64.low %v156_v54, %v151_v57  ;;  %v303_v62 = vmul.u32.u64.high %v156_v54, %v151_v57, %v302_v61  ;;  %v163_v1 = vmul.u32 %v156_v54, %v147_v63 }
  0xe1   :  { %v299_v59 = vmul.u32.u64.low %v156_v54, %v155_v58  ;;  %v300_v60 = vmul.u32.u64.high %v156_v54, %v155_v58, %v299_v59  ;;  %v102_v34 = vadd.f32 %v291_v11, %v24_v30 }
  0xe2   :  { %v166_v0 = vadd.s32 1, %v303_v62 }
  0xe3   :  { %vm165_vm6 = vc.u32 %v300_v60, %v302_v61  ;;  %v164_v17 = vadd.s32 %v302_v61, %v300_v60  ;;  %v106_v37 = vmul.f32 1.442695, %v102_v34 }
  0xe4   :  { %v167_v2 = vsel %vm165_vm6, %v166_v0, %v303_v62 }
  0xe5   :  { %v168_v3 = vadd.s32 %v167_v2, %v163_v1 }
  0xe7   :  { %v169_v4 = vadd.s32 536870912, %v168_v3 }
  0xe9   :  { %v170_v5 = vshrl.u32 %v169_v4, 30 }
  0xeb   :  { %v171_v6 = vshll.u32 %v170_v5, 30  ;;  %v194_v33 = vsub.s32 4, %v170_v5 }
  0xed   :  { %v172_v8 = vsub.s32 %v168_v3, %v171_v6  ;;  %v195_v7 = vsel %vm110_vm8, %v194_v33, %v170_v5 }
  0xee   :  { %v197_v38 = vsel %vm109_vm9, 0, %v195_v7 }
  0xef   :  { %v174_v10 = vsub.s32 0, %v172_v8  ;;  %v201_v9 = vadd.s32 3, %v197_v38 }
  0xf1   :  { %v220_v12 = vmin.u32 %v174_v10, %v172_v8  ;;  %v202_v39 = vand.u32 3, %v201_v9 }
  0xf3   :  { %v176_v14 = vclz %v220_v12  ;;  %vm207_vm10 = vcmp.eq.s32.totalorder %v202_v39, 2  ;;  %vm204_vm11 = vcmp.eq.s32.totalorder %v202_v39, 0  ;;  %vm203_vm12 = vcmp.lt.s32.totalorder %v202_v39, 2 }
  0xf5   :  { %v221_v15 = vadd.s32 4294967294, %v176_v14 }
  0xf7   :  { %vm222_vm7 = vcmp.lt.s32.totalorder %v221_v15, 0 }
  0xf8   :  { %v179_v16 = vsel %vm222_vm7, 0, %v221_v15 }
  0xf9   :  { %v180_v19 = vsub.s32 32, %v179_v16  ;;  %v184_v20 = vsub.s32 4294967266, %v179_v16  ;;  %v181_v21 = vshll.u32 %v172_v8, %v179_v16 }
  0xfb   :  { %v182_v22 = vshrl.u32 %v164_v17, %v180_v19  ;;  %v185_v23 = vadd.s32 127, %v184_v20 }
  0xfd   :  { %v183_v24 = vor.u32 %v182_v22, %v181_v21  ;;  %v186_v25 = vshll.u32 %v185_v23, 23 }
  0xff   :  { %v187_v27 = vor.u32 4788187, %v186_v25  ;;  %v190_v29 = vcvt.s32.f32 %v183_v24 }
 0x101   :  { %v188_v28 = vand.u32 2147483647, %v187_v27 }
 0x103   :  { %v191_v31 = vmul.f32 %v190_v29, %v188_v28 }
 0x105   :  { %v192_v32 = vxor.u32 2147483648, %v191_v31 }
 0x107   :  { %v193_v35 = vsel %vm110_vm8, %v192_v32, %v191_v31 }
 0x108   :  { %v196_v36 = vsel %vm109_vm9, %v293_v13, %v193_v35 }
 0x109   :  { %234 = vcosq.f32 %v196_v36 }
 0x10a   :  { %236 = vsinq.f32 %v196_v36 }
 0x10b   :  { %238 = vpow2.f32 %v106_v37 }
 0x116   :  { %v235_v40 = vpop.eup %234 }
 0x117   :  { %v237_v41 = vpop.eup %236  ;;  %v208_v42 = vxor.u32 2147483648, %v235_v40 }
 0x118   :  { %v205_v43 = vxor.u32 2147483648, %v237_v41  ;;  %v239_v45 = vpop.eup %238 }
 0x119   :  { %v209_v11 = vsel %vm207_vm10, %v208_v42, %v237_v41 }
 0x11a   :  { %v206_v18 = vsel %vm204_vm11, %v235_v40, %v205_v43 }
 0x11b   :  { %v210_v44 = vsel %vm203_vm12, %v206_v18, %v209_v11 }
 0x11c   :  { %v211_v46 = vsel %vm200_vm13, nan, %v210_v44 }
 0x11d   :  { %v212_v47 = vmul.f32 %v239_v45, %v211_v46 }
 0x11f   :  { %213 = vst [vmem:[%s323_s3] sm:$0xf] %v212_v47 }

</bundles_post_ra>
